<compile_context>
chip_gen: v5e
topology: v5e:2x2
jax: 0.10.0
libtpu: 0.0.40
codegen_flags: <defaults>
</compile_context>

<pallas_src>
import math
import jax
import jax.numpy as jnp
from jax import lax
from jax.experimental import pallas as pl
from jax.experimental.pallas import tpu as pltpu


def _round_up(x, m):
    return ((x + m - 1) // m) * m


def _cdiv(a, b):
    return (a + b - 1) // b


def _pick_batch_tiling(batch, max_block_m=128):
    """Pick (BLOCK_M, B_pad).

    * BLOCK_M is a multiple of 8 sublanes and <= max_block_m,
    * >= 2 batch tiles whenever the padded batch allows it (so the "parallel"
      batch axis can be sharded across both TensorCores on v7x),
    * BLOCK_M (nearly) divides the padded batch, so padding waste is minimal
      (no 256-row blow-ups for small inference batches).
    """
    b8 = _round_up(max(batch, 1), 8)
    if b8 <= 8:
        return 8, 8
    n_tiles = max(2, _cdiv(b8, max_block_m))
    bm = _round_up(_cdiv(b8, n_tiles), 8)
    return bm, bm * n_tiles


# ----------------------------------------------------------------------------
# Pallas kernel: fused ImageClassifFC head (Linear -> GeLU -> LN -> Linear)
# ----------------------------------------------------------------------------
def image_classif_fc_kernel(x_ref, w1_ref, b1_ref, gamma_ref, beta_ref,
                            w2_ref, b2_ref, out_ref):
    # x_ref:     (BM, H)      batch tile of pooled_output_v, bf16
    # w1_ref:    (H, 2H)      Linear-1 weight, bf16, VMEM-resident (Buffered(1))
    # b1_ref:    (1, 2H)      f32, resident
    # gamma_ref: (1, 2H)      LayerNorm weight, f32, resident
    # beta_ref:  (1, 2H)      LayerNorm bias, f32, resident
    # w2_ref:    (2H, Lp)     Linear-2 weight (label-padded), bf16, resident
    # b2_ref:    (1, Lp)      f32 (zero-padded), resident
    # out_ref:   (BM, Lp)     logits tile, f32, lane-dense

    # Linear 1: bf16 x bf16 on the MXU, f32 accumulation.
    h = jnp.dot(x_ref[...], w1_ref[...],
                preferred_element_type=jnp.float32) + b1_ref[...]

    # Exact GeLU (erf), matching the module's GeLU(); f32.
    h = h * 0.5 * (1.0 + lax.erf(h * (1.0 / math.sqrt(2.0))))

    # BertLayerNorm(eps=1e-12), single-pass statistics: var = E[h^2] - mu^2
    # (one VPU pass over h instead of two; clamp guards f32 cancellation).
    mu = jnp.mean(h, axis=-1, keepdims=True)
    var = jnp.maximum(jnp.mean(h * h, axis=-1, keepdims=True) - mu * mu, 0.0)
    hn = (h - mu) * lax.rsqrt(var + 1e-12)
    hn = hn * gamma_ref[...] + beta_ref[...]

    # Linear 2: feed the normalized hidden straight into the second matmul.
    logits = jnp.dot(hn.astype(jnp.bfloat16), w2_ref[...],
                     preferred_element_type=jnp.float32) + b2_ref[...]
    out_ref[...] = logits.astype(out_ref.dtype)


def image_classif_fc(pooled_output_v, params):
    """Fused ImageClassifFC head: 1-D batch-tiled Pallas call, w2 resident."""
    B = pooled_output_v.shape[0]
    H, H2 = params["w1"].shape
    L_pad = params["w2"].shape[1]       # padded once at init (multiple of 128)
    L = params["num_labels"]

    BLOCK_M, B_pad = _pick_batch_tiling(B)

    # Only the activation needs per-call padding; weights were padded at init.
    # x is stored bf16 (it is consumed as bf16 by the MXU anyway).
    x_bf16 = pooled_output_v.astype(jnp.bfloat16)
    if B_pad != B:
        x_bf16 = jnp.zeros((B_pad, H), jnp.bfloat16).at[:B].set(x_bf16)

    # VMEM budget: resident weights (single-buffered) + pipelined x/out tiles
    # + f32 temporaries for the GeLU/LayerNorm intermediate, with headroom.
    resident = (H * H2 + H2 * L_pad) * 2 + (3 * H2 + L_pad) * 4
    pipelined = 2 * BLOCK_M * H * 2 + 2 * BLOCK_M * L_pad * 4
    temporaries = 4 * BLOCK_M * H2 * 4
    vmem_limit = int(min(max((resident + pipelined + temporaries) * 3 // 2,
                             32 << 20), 96 << 20))

    def _resident(shape):
        # Constant-index-map operands: single VMEM buffer, no double buffering.
        return pl.BlockSpec(shape, lambda i: (0, 0),
                            pipeline_mode=pl.Buffered(1))

    grid = (B_pad // BLOCK_M,)

    # TODO(synk): if num_labels ever grows so large that w2 (bf16, H2 x L_pad)
    # no longer fits VMEM-resident, re-introduce an "arbitrary" label grid
    # axis with a per-batch-tile hidden-state scratch.
    out_pad = pl.pallas_call(
        image_classif_fc_kernel,
        out_shape=jax.ShapeDtypeStruct((B_pad, L_pad), jnp.float32),
        grid=grid,
        in_specs=[
            pl.BlockSpec((BLOCK_M, H), lambda i: (i, 0)),    # x (batch tile)
            _resident((H, H2)),                              # w1
            _resident((1, H2)),                              # b1
            _resident((1, H2)),                              # gamma
            _resident((1, H2)),                              # beta
            _resident((H2, L_pad)),                          # w2
            _resident((1, L_pad)),                           # b2
        ],
        out_specs=pl.BlockSpec((BLOCK_M, L_pad), lambda i: (i, 0)),
        compiler_params=pltpu.CompilerParams(
            dimension_semantics=("parallel",),
            vmem_limit_bytes=vmem_limit),
    )(x_bf16, params["w1"], params["b1"], params["gamma"], params["beta"],
      params["w2"], params["b2"])

    return out_pad[:B, :L]


# ----------------------------------------------------------------------------
# Glue: deterministic parameter init + tiny stand-in for the ViLBERT backbone
# ----------------------------------------------------------------------------
def init_params(key, bi_hidden_size, num_labels, feat_dim):
    H, H2, L = bi_hidden_size, 2 * bi_hidden_size, num_labels
    L_pad = _round_up(max(L, 1), 128)   # lane-dense logits: pad ONCE, here.
    ks = jax.random.split(key, 4)
    w2 = (jax.random.normal(ks[1], (H2, L), jnp.float32) * 0.02
          ).astype(jnp.bfloat16)
    p = {
        # ImageClassifFC (Pallas kernel params); matmul weights stored bf16,
        # second-layer weight/bias pre-padded to the lane-dense label width.
        "w1": (jax.random.normal(ks[0], (H, H2), jnp.float32) * 0.02
               ).astype(jnp.bfloat16),
        "b1": jnp.zeros((1, H2), jnp.float32),
        "gamma": jnp.ones((1, H2), jnp.float32),
        "beta": jnp.zeros((1, H2), jnp.float32),
        "w2": jnp.zeros((H2, L_pad), jnp.bfloat16).at[:, :L].set(w2),
        "b2": jnp.zeros((1, L_pad), jnp.float32),
        "num_labels": L,
        # stand-in visual pooler (plain-JAX glue)
        "wv": jax.random.normal(ks[2], (feat_dim, H), jnp.float32) * 0.02,
        "bv": jnp.zeros((H,), jnp.float32),
        "wp": jax.random.normal(ks[3], (H, H), jnp.float32) * 0.02,
        "bp": jnp.zeros((H,), jnp.float32),
    }
    return p


def vilbert_base_stub(input_txt, input_imgs, image_loc, params):
    """Tiny deterministic stand-in producing pooled_output_v (B, H)."""
    # TODO(synk): the full pretrained ViLBERT co-attention transformer
    # (VILBertForVLTasks) cannot be reproduced from this module alone; this
    # stub mean-pools image regions and applies a Bert-style pooler.
    feats = input_imgs.mean(axis=1)                                   # (B, F)
    seq_v = jnp.tanh(feats @ params["wv"] + params["bv"])             # (B, H)
    pooled_output_v = jnp.tanh(seq_v @ params["wp"] + params["bp"])   # (B, H)
    return pooled_output_v


def vilbert_image_classification_forward(input_txt, input_imgs, image_loc, params):
    pooled_output_v = vilbert_base_stub(input_txt, input_imgs, image_loc, params)
    image_logits = image_classif_fc(pooled_output_v, params)
    return image_logits, pooled_output_v


# ----------------------------------------------------------------------------
# Reference (plain JAX, same bf16 matmul numerics) for a correctness check
# ----------------------------------------------------------------------------
def head_reference(x, p):
    L = p["num_labels"]
    xb = x.astype(jnp.bfloat16)
    h = jnp.dot(xb, p["w1"], preferred_element_type=jnp.float32) + p["b1"]
    h = h * 0.5 * (1.0 + lax.erf(h / math.sqrt(2.0)))
    mu = h.mean(-1, keepdims=True)
    var = ((h - mu) ** 2).mean(-1, keepdims=True)
    hn = (h - mu) / jnp.sqrt(var + 1e-12) * p["gamma"] + p["beta"]
    logits = jnp.dot(hn.astype(jnp.bfloat16), p["w2"],
                     preferred_element_type=jnp.float32) + p["b2"]
    return logits[:, :L]


if __name__ == "__main__":
    B = 2                # batch
    SEQ = 8              # text sequence length
    NUM_REGIONS = 8      # image regions
    FEAT_DIM = 16        # image feature dim
    BI_HIDDEN = 32       # config.bi_hidden_size
    NUM_LABELS = 4

    key = jax.random.PRNGKey(0)
    k_img, k_loc, k_txt, k_par = jax.random.split(key, 4)

    input_txt = jax.random.randint(k_txt, (B, SEQ), 0, 1000, dtype=jnp.int32)
    input_imgs = jax.random.normal(k_img, (B, NUM_REGIONS, FEAT_DIM), jnp.float32)
    image_loc = jax.random.uniform(k_loc, (B, NUM_REGIONS, 5), jnp.float32)

    params = init_params(k_par, BI_HIDDEN, NUM_LABELS, FEAT_DIM)

    logits, pooled_v = vilbert_image_classification_forward(
        input_txt, input_imgs, image_loc, params)
    jax.block_until_ready(logits)

    # sanity check against a plain-JAX reference of the head (same bf16 numerics)
    ref = head_reference(pooled_v, params)
    assert logits.shape == (B, NUM_LABELS)
    assert jnp.allclose(logits, ref, atol=2e-3, rtol=2e-3), "mismatch vs reference"

    print("KERNEL_OK")
</pallas_src>

<mosaic_0001>
module attributes {stable_mosaic.version = 11 : i64} {
  func.func @image_classif_fc_kernel(%arg0: i32, %arg1: memref<8x32xbf16, #tpu.memory_space<vmem>>, %arg2: memref<32x64xbf16, #tpu.memory_space<vmem>>, %arg3: memref<1x64xf32, #tpu.memory_space<vmem>>, %arg4: memref<1x64xf32, #tpu.memory_space<vmem>>, %arg5: memref<1x64xf32, #tpu.memory_space<vmem>>, %arg6: memref<64x128xbf16, #tpu.memory_space<vmem>>, %arg7: memref<1x128xf32, #tpu.memory_space<vmem>>, %arg8: memref<8x128xf32, #tpu.memory_space<vmem>>) attributes {dimension_semantics = [#tpu.dimension_semantics<parallel>], iteration_bounds = array<i64: 1>, scalar_prefetch = 0 : i64, scratch_operands = 0 : i64, tpu.core_type = #tpu.core_type<tc>, window_params = [{transform_indices = @transform_0, window_bounds = array<i64: 8, 32>}, {pipeline_mode = #tpu.pipeline_mode<synchronous>, transform_indices = @transform_1, window_bounds = array<i64: 32, 64>}, {pipeline_mode = #tpu.pipeline_mode<synchronous>, transform_indices = @transform_2, window_bounds = array<i64: 1, 64>}, {pipeline_mode = #tpu.pipeline_mode<synchronous>, transform_indices = @transform_3, window_bounds = array<i64: 1, 64>}, {pipeline_mode = #tpu.pipeline_mode<synchronous>, transform_indices = @transform_4, window_bounds = array<i64: 1, 64>}, {pipeline_mode = #tpu.pipeline_mode<synchronous>, transform_indices = @transform_5, window_bounds = array<i64: 64, 128>}, {pipeline_mode = #tpu.pipeline_mode<synchronous>, transform_indices = @transform_6, window_bounds = array<i64: 1, 128>}, {transform_indices = @transform_7, window_bounds = array<i64: 8, 128>}]} {
    %c0 = arith.constant 0 : index
    %c0_0 = arith.constant 0 : index
    %0 = vector.load %arg1[%c0, %c0_0] : memref<8x32xbf16, #tpu.memory_space<vmem>>, vector<8x32xbf16>
    %c0_1 = arith.constant 0 : index
    %c0_2 = arith.constant 0 : index
    %1 = vector.load %arg2[%c0_1, %c0_2] : memref<32x64xbf16, #tpu.memory_space<vmem>>, vector<32x64xbf16>
    %cst = arith.constant dense<0.000000e+00> : vector<8x64xf32>
    %2 = tpu.matmul %0, %1, %cst {dimension_numbers = #tpu.dot_dimension_numbers<[1], [0], [0], [1], [0, 0, 1, 1], [], []>} : vector<8x32xbf16>, vector<32x64xbf16>, vector<8x64xf32> -> vector<8x64xf32>
    %c0_3 = arith.constant 0 : index
    %c0_4 = arith.constant 0 : index
    %3 = vector.load %arg3[%c0_3, %c0_4] : memref<1x64xf32, #tpu.memory_space<vmem>>, vector<1x64xf32>
    %4 = vector.broadcast %3 : vector<1x64xf32> to vector<8x64xf32>
    %5 = arith.addf %2, %4 : vector<8x64xf32>
    %cst_5 = arith.constant 5.000000e-01 : f32
    %6 = vector.broadcast %cst_5 : f32 to vector<8x64xf32>
    %7 = arith.mulf %5, %6 : vector<8x64xf32>
    %cst_6 = arith.constant 0.707106769 : f32
    %8 = vector.broadcast %cst_6 : f32 to vector<8x64xf32>
    %9 = arith.mulf %5, %8 : vector<8x64xf32>
    %10 = math.erf %9 : vector<8x64xf32>
    %cst_7 = arith.constant 1.000000e+00 : f32
    %11 = vector.broadcast %cst_7 : f32 to vector<8x64xf32>
    %12 = arith.addf %11, %10 : vector<8x64xf32>
    %13 = arith.mulf %7, %12 : vector<8x64xf32>
    %cst_8 = arith.constant dense<0.000000e+00> : vector<8xf32>
    %14 = vector.multi_reduction <add>, %13, %cst_8 [1] : vector<8x64xf32> to vector<8xf32>
    %15 = vector.shape_cast %14 : vector<8xf32> to vector<8x1xf32>
    %cst_9 = arith.constant 6.400000e+01 : f32
    %16 = vector.broadcast %cst_9 : f32 to vector<8x1xf32>
    %17 = arith.divf %15, %16 : vector<8x1xf32>
    %18 = arith.mulf %13, %13 : vector<8x64xf32>
    %cst_10 = arith.constant dense<0.000000e+00> : vector<8xf32>
    %19 = vector.multi_reduction <add>, %18, %cst_10 [1] : vector<8x64xf32> to vector<8xf32>
    %20 = vector.shape_cast %19 : vector<8xf32> to vector<8x1xf32>
    %cst_11 = arith.constant 6.400000e+01 : f32
    %21 = vector.broadcast %cst_11 : f32 to vector<8x1xf32>
    %22 = arith.divf %20, %21 : vector<8x1xf32>
    %23 = arith.mulf %17, %17 : vector<8x1xf32>
    %24 = arith.subf %22, %23 : vector<8x1xf32>
    %cst_12 = arith.constant 0.000000e+00 : f32
    %25 = vector.broadcast %cst_12 : f32 to vector<8x1xf32>
    %26 = arith.maximumf %24, %25 : vector<8x1xf32>
    %27 = vector.broadcast %17 : vector<8x1xf32> to vector<8x64xf32>
    %28 = arith.subf %13, %27 : vector<8x64xf32>
    %cst_13 = arith.constant 9.99999996E-13 : f32
    %29 = vector.broadcast %cst_13 : f32 to vector<8x1xf32>
    %30 = arith.addf %26, %29 : vector<8x1xf32>
    %31 = math.rsqrt %30 : vector<8x1xf32>
    %32 = vector.broadcast %31 : vector<8x1xf32> to vector<8x64xf32>
    %33 = arith.mulf %28, %32 : vector<8x64xf32>
    %c0_14 = arith.constant 0 : index
    %c0_15 = arith.constant 0 : index
    %34 = vector.load %arg4[%c0_14, %c0_15] : memref<1x64xf32, #tpu.memory_space<vmem>>, vector<1x64xf32>
    %35 = vector.broadcast %34 : vector<1x64xf32> to vector<8x64xf32>
    %36 = arith.mulf %33, %35 : vector<8x64xf32>
    %c0_16 = arith.constant 0 : index
    %c0_17 = arith.constant 0 : index
    %37 = vector.load %arg5[%c0_16, %c0_17] : memref<1x64xf32, #tpu.memory_space<vmem>>, vector<1x64xf32>
    %38 = vector.broadcast %37 : vector<1x64xf32> to vector<8x64xf32>
    %39 = arith.addf %36, %38 : vector<8x64xf32>
    %40 = arith.truncf %39 : vector<8x64xf32> to vector<8x64xbf16>
    %c0_18 = arith.constant 0 : index
    %c0_19 = arith.constant 0 : index
    %41 = vector.load %arg6[%c0_18, %c0_19] : memref<64x128xbf16, #tpu.memory_space<vmem>>, vector<64x128xbf16>
    %cst_20 = arith.constant dense<0.000000e+00> : vector<8x128xf32>
    %42 = tpu.matmul %40, %41, %cst_20 {dimension_numbers = #tpu.dot_dimension_numbers<[1], [0], [0], [1], [0, 0, 1, 1], [], []>} : vector<8x64xbf16>, vector<64x128xbf16>, vector<8x128xf32> -> vector<8x128xf32>
    %c0_21 = arith.constant 0 : index
    %c0_22 = arith.constant 0 : index
    %43 = vector.load %arg7[%c0_21, %c0_22] : memref<1x128xf32, #tpu.memory_space<vmem>>, vector<1x128xf32>
    %44 = vector.broadcast %43 : vector<1x128xf32> to vector<8x128xf32>
    %45 = arith.addf %42, %44 : vector<8x128xf32>
    %c0_23 = arith.constant 0 : index
    %c0_24 = arith.constant 0 : index
    %46 = vector.load %arg8[%c0_23, %c0_24] : memref<8x128xf32, #tpu.memory_space<vmem>>, vector<8x128xf32>
    tpu.vector_store %arg8[%c0_23, %c0_24], %45 {strides = array<i32>} : memref<8x128xf32, #tpu.memory_space<vmem>>, vector<8x128xf32>,
    return
  }
  func.func @transform_0(%arg0: i32) -> (i32, i32) {
    %c0_i32 = arith.constant 0 : i32
    %c0_i32_0 = arith.constant 0 : i32
    return %arg0, %c0_i32 : i32, i32
  }
  func.func @transform_1(%arg0: i32) -> (i32, i32) {
    %c0_i32 = arith.constant 0 : i32
    %c0_i32_0 = arith.constant 0 : i32
    %c0_i32_1 = arith.constant 0 : i32
    return %c0_i32, %c0_i32_0 : i32, i32
  }
  func.func @transform_2(%arg0: i32) -> (i32, i32) {
    %c0_i32 = arith.constant 0 : i32
    %c0_i32_0 = arith.constant 0 : i32
    %c0_i32_1 = arith.constant 0 : i32
    return %c0_i32, %c0_i32_0 : i32, i32
  }
  func.func @transform_3(%arg0: i32) -> (i32, i32) {
    %c0_i32 = arith.constant 0 : i32
    %c0_i32_0 = arith.constant 0 : i32
    %c0_i32_1 = arith.constant 0 : i32
    return %c0_i32, %c0_i32_0 : i32, i32
  }
  func.func @transform_4(%arg0: i32) -> (i32, i32) {
    %c0_i32 = arith.constant 0 : i32
    %c0_i32_0 = arith.constant 0 : i32
    %c0_i32_1 = arith.constant 0 : i32
    return %c0_i32, %c0_i32_0 : i32, i32
  }
  func.func @transform_5(%arg0: i32) -> (i32, i32) {
    %c0_i32 = arith.constant 0 : i32
    %c0_i32_0 = arith.constant 0 : i32
    %c0_i32_1 = arith.constant 0 : i32
    return %c0_i32, %c0_i32_0 : i32, i32
  }
  func.func @transform_6(%arg0: i32) -> (i32, i32) {
    %c0_i32 = arith.constant 0 : i32
    %c0_i32_0 = arith.constant 0 : i32
    %c0_i32_1 = arith.constant 0 : i32
    return %c0_i32, %c0_i32_0 : i32, i32
  }
  func.func @transform_7(%arg0: i32) -> (i32, i32) {
    %c0_i32 = arith.constant 0 : i32
    %c0_i32_0 = arith.constant 0 : i32
    return %arg0, %c0_i32 : i32, i32
  }
}

</mosaic_0001>

<bundles_post_ra>
// kernel: tpu_custom_call.1
= control target key start
LH: loop header
LB: loop body
LE: loop exit
PB: predicated region body
PF: predicated region fallthrough
CT: control target
= control target key end

     0   :  { %12 = vsyncpa [#allocation3], 0  ;;  %s496_s0 = inlined_call_operand.hbm [shape: bf16[8,32], index: 0, kind: input, shape index: {}]   ;;  %s497_s1 = inlined_call_operand.hbm [shape: bf16[32,64], index: 1, kind: input, shape index: {}]   ;;  %s498_s2 = inlined_call_operand.vmem [shape: f32[1,64], index: 2, kind: input, shape index: {}]   ;;  %s499_s3 = inlined_call_operand.vmem [shape: f32[1,64], index: 3, kind: input, shape index: {}]   ;;  %s500_s4 = inlined_call_operand.vmem [shape: f32[1,64], index: 4, kind: input, shape index: {}]   ;;  %s501_s5 = inlined_call_operand.hbm [shape: bf16[64,128], index: 5, kind: input, shape index: {}]   ;;  %s502_s6 = inlined_call_operand.vmem [shape: f32[1,128], index: 6, kind: input, shape index: {}]   ;;  %s503_s7 = inlined_call_operand.hbm [shape: f32[8,128], index: 7, kind: output, shape index: {}]  }
   0x1   :  { %13 = vsyncpa [#allocation6], 0  ;;  %s30_s26 = sshll.u32 %s497_s1, 4  ;;  %s31_s26 = int_to_ptr.hbm [resolvable:$true] %s30_s26 }
   0x2   :  { %14 = vsyncpa [#allocation4], 0  ;;  %s422_s27 = smov [#allocation5]   ;;  %s20_s8 = sshll.u32 %s496_s0, 4  ;;  %s21_s8 = int_to_ptr.hbm [resolvable:$true] %s20_s8 }
   0x3   :  { %s32_s28 = sshll.u32 %s422_s27, 4  ;;  %s423_s9 = smov 64   ;;  %s33_s28 = int_to_ptr.vmem [resolvable:$true] %s32_s28 }
   0x4   :  { %s424_s10 = smov 4   ;;  %s425_s11 = smov [#allocation2]  }
   0x5   :  { %38 = dma.hbm_to_vmem [thread:$0]  %s31_s26, 256, %s33_s28, [#allocation6], %s423_s9, %s423_s9, %s424_s10  }
   0x6   :  { %s22_s12 = sshll.u32 %s425_s11, 4  ;;  %s49_s15 = sshll.u32 %s501_s5, 4  ;;  %s23_s12 = int_to_ptr.vmem [resolvable:$true] %s22_s12  ;;  %s50_s15 = int_to_ptr.hbm [resolvable:$true] %s49_s15 }
   0x7   :  { %25 = dma.hbm_to_vmem [thread:$0]  %s21_s8, 64, %s23_s12, [#allocation3]  }
   0x8   :  { %s426_s1 = smov [#allocation7]  }
   0x9   :  { %s51_s16 = sshll.u32 %s426_s1, 4  ;;  %s52_s16 = int_to_ptr.vmem [resolvable:$true] %s51_s16 }
   0xa   :  { %57 = dma.hbm_to_vmem [thread:$0]  %s50_s15, 512, %s52_s16, [#allocation6], %s423_s9, %s423_s9, %s424_s10  }
   0xb   :  { %416 = dma.done.wait [#allocation3], 64  }
   0xc   :  { %417 = vsyncadd [#allocation3], 4294967232 }
   0xd   :  { %418 = dma.done.wait [#allocation6], 768  }
   0xe   :  { %419 = vsyncadd [#allocation6], 4294966528  ;;  %v298_v0 = vld [vmem:[#allocation5 + $0x8] sm:$0xff]  ;;  %v297_v1 = vld [vmem:[#allocation5] sm:$0xff]  ;;  %vm94_vm0 = vcmask 261120   ;;  %vm155_vm5 = vcmask 523264  }
   0xf   :  { %104 = vmatpush.bf16.msra.mxu0 %v298_v0  ;;  %v73_v2 = vld [vmem:[#allocation2] sm:$0xf]  ;;  %v427_v49 = vmov 64.0   ;;  %v302_v54 = vld [vmem:[#allocation7 + $0x18] sm:$0xff]  ;;  %v301_v56 = vld [vmem:[#allocation7 + $0x10] sm:$0xff]  ;;  %s428_s22 = smov [#allocation8]  }
  0x10   :  { %v310_v3 = vld [vmem:[%s498_s2] ss:$0 sm:$0xff]  ;;  %242 = vmatpush.bf16.msra.mxu1 %v302_v54  ;;  %v299_v61 = vld [vmem:[#allocation7] sm:$0xff]  ;;  %s257_s23 = sshll.u32 %s428_s22, 4  ;;  %s258_s23 = int_to_ptr.vmem [resolvable:$true] %s257_s23 }
  0x11   :  { %v300_v58 = vld [vmem:[#allocation7 + $0x8] sm:$0xff] }
  0x13   :  { %105 = vmatpush.bf16.msra.mxu0 %v297_v1 }
  0x14   :  { %243 = vmatpush.bf16.msra.mxu1 %v301_v56 }
  0x16   :  { %278 = vmatmul.msk.bf16.vlgmr.msra.gmra.mxu0 %vm94_vm0, %v73_v2 }
  0x18   :  { %244 = vmatpush.bf16.msra.mxu1 %v300_v58 }
  0x1c   :  { %245 = vmatpush.bf16.msra.mxu1 %v299_v61 }
  0x93   :  { %v107_v4 = vpop.f32.mrf.mxu0 }
  0x94   :  { %v108_v5 = vadd.f32 %v310_v3, %v107_v4 }
  0x96   :  { %v112_v6 = vmul.f32 0.70710677, %v108_v5  ;;  %v111_v43 = vmul.f32 0.5, %v108_v5 }
  0x98   :  { %v113_v7 = vmul.f32 %v112_v6, %v112_v6 }
  0x9a   :  { %v114_v8 = vmin.f32 %v113_v7, 16.0 }
  0x9b   :  { %v109_v9 = vpop.f32.mrf.mxu0 }
  0x9c   :  { %v115_v10 = vmul.f32 2.1237322e-06, %v114_v8  ;;  %v126_v11 = vmul.f32 3.8918573e-05, %v114_v8 }
  0x9e   :  { %v116_v12 = vadd.f32 0.00028619796, %v115_v10  ;;  %v127_v13 = vadd.f32 0.001143296, %v126_v11  ;;  %v311_v11 = vld [vmem:[%s499_s3] ss:$0 sm:$0xff] }
  0x9f   :  { %s259_s3 = sshll.u32 %s503_s7, 4  ;;  %s260_s3 = int_to_ptr.hbm [resolvable:$true] %s259_s3 }
  0xa0   :  { %v117_v14 = vmul.f32 %v116_v12, %v114_v8  ;;  %v128_v15 = vmul.f32 %v127_v13, %v114_v8 }
  0xa2   :  { %v129_v16 = vadd.f32 0.014752088, %v128_v15  ;;  %v118_v17 = vadd.f32 0.0036580483, %v117_v14  ;;  %v312_v14 = vld [vmem:[%s500_s4] ss:$0 sm:$0xff] }
  0xa4   :  { %v130_v18 = vmul.f32 %v129_v16, %v114_v8  ;;  %v119_v20 = vmul.f32 %v118_v17, %v114_v8 }
  0xa6   :  { %v131_v19 = vadd.f32 0.112945676, %v130_v18  ;;  %v120_v23 = vadd.f32 0.05243302, %v119_v20  ;;  %v313_v18 = vld [vmem:[%s502_s6] ss:$0 sm:$0xff] }
  0xa8   :  { %v132_v21 = vmul.f32 %v131_v19, %v114_v8  ;;  %v121_v26 = vmul.f32 %v120_v23, %v114_v8 }
  0xaa   :  { %v133_v22 = vadd.f32 0.4994258, %v132_v21  ;;  %v122_v27 = vadd.f32 0.18741608, %v121_v26 }
  0xac   :  { %v134_v24 = vmul.f32 %v133_v22, %v114_v8  ;;  %v123_v29 = vmul.f32 %v122_v27, %v114_v8 }
  0xae   :  { %v135_v25 = vadd.f32 1.0, %v134_v24  ;;  %v124_v33 = vadd.f32 1.1283791, %v123_v29 }
  0xb0   :  { %314 = vrcp.f32 %v135_v25  ;;  %v147_v32 = vand.u32 2147483648, %v135_v25  ;;  %v145_v35 = vand.u32 2147483647, %v135_v25  ;;  %vm141_vm2 = vweird.f32 %v135_v25 }
  0xb1   :  { %v125_v38 = vmul.f32 %v124_v33, %v112_v6  ;;  %316 = vrcp.f32 %v427_v49 }
  0xb2   :  { %v148_v37 = vor.u32 1.1754944e-38, %v147_v32  ;;  %vm146_vm4 = vcmp.eq.f32.partialorder %v145_v35, 8.507059e+37 }
  0xb6   :  { %v315_v28 = vpop.eup %314 }
  0xb7   :  { %v137_v30 = vmul.f32 %v315_v28, %v135_v25  ;;  %vm142_vm1 = vweird.f32 %v315_v28  ;;  %v317_v50 = vpop.eup %316 }
  0xb8   :  { %vm143_vm3 = vmor %vm141_vm2, %vm142_vm1  ;;  %v160_v51 = vmul.f32 64.0, %v317_v50  ;;  %vm164_vm6 = vweird.f32 %v317_v50 }
  0xb9   :  { %v138_v31 = vsub.f32 1.0, %v137_v30 }
  0xba   :  { %v161_v52 = vsub.f32 1.0, %v160_v51 }
  0xbb   :  { %v139_v34 = vmul.f32 %v315_v28, %v138_v31 }
  0xbc   :  { %v162_v53 = vmul.f32 %v317_v50, %v161_v52 }
  0xbd   :  { %v140_v36 = vadd.f32 %v315_v28, %v139_v34 }
  0xbe   :  { %v163_v55 = vadd.f32 %v317_v50, %v162_v53 }
  0xbf   :  { %v144_v39 = vsel %vm143_vm3, %v315_v28, %v140_v36 }
  0xc0   :  { %v149_v40 = vsel %vm146_vm4, %v148_v37, %v144_v39  ;;  %v165_v59 = vsel %vm164_vm6, %v317_v50, %v163_v55 }
  0xc1   :  { %v150_v41 = vmul.f32 %v149_v40, %v125_v38 }
  0xc3   :  { %v279_v42 = vclamps-f32 %v150_v41, 1.0 }
  0xc5   :  { %v153_v44 = vadd.f32 1.0, %v279_v42 }
  0xc7   :  { %v154_v45 = vmul.f32 %v153_v44, %v111_v43 }
  0xc9   :  { %v156_v46 = vsel %vm155_vm5, %v154_v45, 0.0  ;;  %v167_v47 = vmul.f32 %v154_v45, %v154_v45 }
  0xca   :  { %157 = vadd.xlane.f32.xlu0 %v156_v46 }
  0xcb   :  { %v168_v48 = vsel %vm155_vm5, %v167_v47, 0.0 }
  0xd2   :  { %169 = vadd.xlane.f32.xlu0 %v168_v48 }
 0x13d   :  { %v158_v57 = vpop.xlane.xlu0 %157 }
 0x13e   :  { %v166_v60 = vmul.f32 %v165_v59, %v158_v57 }
 0x140   :  { %v172_v63 = vmul.f32 %v166_v60, %v166_v60  ;;  %v175_v10 = vsub.f32 %v154_v45, %v166_v60 }
 0x145   :  { %v170_v62 = vpop.xlane.xlu0 %169 }
 0x146   :  { %v171_v0 = vmul.f32 %v170_v62, %v165_v59 }
 0x148   :  { %v173_v1 = vsub.f32 %v171_v0, %v172_v63 }
 0x14a   :  { %v174_v2 = vmax.f32 %v173_v1, 0.0 }
 0x14c   :  { %v176_v3 = vadd.f32 1e-12, %v174_v2 }
 0x14e   :  { %318 = vrsqrt.f32 %v176_v3  ;;  %vm183_vm8 = vweird.f32 %v176_v3 }
 0x154   :  { %v319_v4 = vpop.eup %318 }
 0x155   :  { %v178_v5 = vmul.f32 %v319_v4, %v176_v3  ;;  %vm184_vm7 = vweird.f32 %v319_v4 }
 0x156   :  { %vm185_vm9 = vmor %vm183_vm8, %vm184_vm7 }
 0x157   :  { %v179_v6 = vmul.f32 %v319_v4, %v178_v5 }
 0x159   :  { %v180_v7 = vmul.f32 0.5, %v179_v6 }
 0x15b   :  { %v181_v8 = vsub.f32 1.5, %v180_v7 }
 0x15d   :  { %v182_v9 = vmul.f32 %v319_v4, %v181_v8 }
 0x15f   :  { %v186_v12 = vsel %vm185_vm9, %v319_v4, %v182_v9 }
 0x160   :  { %v187_v13 = vmul.f32 %v186_v12, %v175_v10 }
 0x162   :  { %v192_v15 = vmul.f32 %v311_v11, %v187_v13 }
 0x164   :  { %v197_v16 = vadd.f32 %v312_v14, %v192_v15 }
 0x166   :  { %v198_v17 = vpack.c.bf16 %v197_v16, %v197_v16 }
 0x168   :  { %296 = vmatmul.msk.bf16.vlgmr.msra.gmra.mxu1 %vm155_vm5, %v198_v17 }
 0x1e5   :  { %v247_v19 = vpop.f32.mrf.mxu1 }
 0x1e6   :  { %v248_v20 = vadd.f32 %v313_v18, %v247_v19 }
 0x1e8   :  { %251 = vst [vmem:[#allocation8] sm:$0xff] %v248_v20 }
 0x1e9   :  { %262 = dma.vmem_to_hbm [thread:$0]  %s258_s23, 128, %s260_s3, [#allocation4]  }
 0x1ed   :  { %v249_v21 = vpop.f32.mrf.mxu1 }
 0x1ee   :  { %420 = dma.done.wait [#allocation4], 128  }
 0x1ef   :  { %421 = vsyncadd [#allocation4], 4294967168 }
 0x1f0   :  { %267 = vsyncpa [#allocation3], 1 }
 0x1f1   :  { %268 = vsyncpa [#allocation6], 1 }
 0x1f2   :  { %269 = vsyncpa [#allocation4], 1 }

</bundles_post_ra>
